<compile_context>
chip_gen: v7x
topology: tpu7x:2x2x1
jax: 0.10.0
libtpu: 0.0.40
codegen_flags: <defaults>
</compile_context>

<pallas_src>
import functools

import jax
import jax.numpy as jnp
from jax.experimental import pallas as pl
from jax.experimental.pallas import tpu as pltpu


def _round_up(x, m):
    return ((x + m - 1) // m) * m


def _focal_loss_kernel(logits_ref, targets_ref, out_ref, acc_ref, *,
                       alpha, gamma, n_rows, tile_rows, tiles_per_chunk):
    c = pl.program_id(0)   # parallel chunk index (sharded across TCs on v7x)
    i = pl.program_id(1)   # serial tile index within the chunk

    # Per-chunk vector accumulator init (scratch persists across grid steps).
    @pl.when(i == 0)
    def _init():
        acc_ref[...] = jnp.zeros_like(acc_ref)

    x = logits_ref[...].astype(jnp.float32)          # (TN, C), cast per tile
    t = targets_ref[...]                             # (TN, 1) int32

    # Numerically stable log-softmax denominator (logsumexp per row).
    m = jnp.max(x, axis=-1, keepdims=True)                               # (TN, 1)
    lse = m + jnp.log(jnp.sum(jnp.exp(x - m), axis=-1, keepdims=True))   # (TN, 1)

    # Gather the target logit via a one-hot compare (no dynamic gather on TPU).
    # Iota is a single (1, C) row; broadcasting against (TN, 1) targets expands it.
    col = jax.lax.broadcasted_iota(jnp.int32, (1, x.shape[-1]), 1)        # (1, C)
    tgt_logit = jnp.sum(jnp.where(col == t, x, 0.0), axis=-1, keepdims=True)

    # Per-sample cross entropy, clamped so rounding can't make it negative.
    ce = jnp.maximum(lse - tgt_logit, 0.0)            # (TN, 1)
    pt = jnp.exp(-ce)
    w = jnp.maximum(1.0 - pt, 0.0)

    # Focal weight: integer gamma -> repeated VPU multiplies (no EUP pow).
    g = float(gamma)
    if g == int(g) and int(g) >= 0:
        wg = jnp.ones_like(w)
        for _ in range(int(g)):
            wg = wg * w
    else:
        wg = w ** jnp.float32(g)
    focal = jnp.float32(alpha) * wg * ce              # (TN, 1)

    # Mask rows past the true batch (ragged last tile, or clamped surplus tiles).
    # The mask uses the *logical* (unclamped) row offset of this grid step.
    blk = c * tiles_per_chunk + i
    row = jax.lax.broadcasted_iota(jnp.int32, focal.shape, 0) + blk * tile_rows
    focal = jnp.where(row < n_rows, focal, 0.0)

    # Vector accumulate: pure VPU, no per-step XLU reduce / output store.
    acc_ref[...] += focal

    # Finalize this chunk: one reduce-to-scalar, one lane-dense (8,128) store.
    @pl.when(i == pl.num_programs(1) - 1)
    def _finalize():
        total = jnp.sum(acc_ref[...], keepdims=True)          # (1, 1)
        row0 = jax.lax.broadcasted_iota(jnp.int32, (8, 128), 0) == 0
        col0 = jax.lax.broadcasted_iota(jnp.int32, (8, 128), 1) == 0
        out_ref[...] = jnp.where(jnp.logical_and(row0, col0), total, 0.0)


def focal_loss(logits, targets, alpha=0.25, gamma=2, reduction="mean",
               tile_rows=None, num_core_chunks=2):
    """Pallas equivalent of FocalLoss(alpha, gamma, reduction).forward.

    Supports reduction='mean' and 'sum' (scalar outputs).
    """
    # TODO(synk): reduction='none' (per-sample vector output) is not implemented
    # by this scalar-reduction kernel.
    assert reduction in ("mean", "sum"), "only 'mean'/'sum' implemented in-kernel"
    if float(gamma) < 0:
        raise ValueError("gamma must be >= 0 (negative gamma would overflow).")

    n, c = logits.shape
    targets2d = targets.astype(jnp.int32).reshape(n, 1)

    # Generation-aware VMEM budget: ~40% of physical for the working set,
    # capped at 48 MiB (so v5e/v6e use ~48 MiB, v7x ~26 MiB of its 64 MiB).
    try:
        vmem_cap = int(pltpu.get_tpu_info().vmem_capacity_bytes)
    except Exception:
        vmem_cap = 64 * 1024 * 1024   # conservative (v7x-sized) fallback
    budget_bytes = min(int(0.40 * vmem_cap), 48 * 1024 * 1024)
    vmem_limit_bytes = int(min(0.70 * vmem_cap, 2.0 * budget_bytes))

    # Per-row VMEM footprint uses the *lane-padded* block width:
    #   2x (TN, round_up(C,128)) logits buffers (double-buffered, native dtype)
    # + 2x (TN, 128) int32 targets buffers (the (TN,1) block lane-pads to 128)
    # + 1x (TN, 128) f32 accumulator scratch (single-buffered).
    itemsize = jnp.dtype(logits.dtype).itemsize
    c_pad = _round_up(c, 128)
    per_row_bytes = 2 * c_pad * itemsize + 2 * 128 * 4 + 128 * 4

    if tile_rows is None:
        # No artificial cap: grow the tile until the VMEM budget so the
        # per-step logits DMA is multi-MiB and step overhead is amortized.
        tile_rows = max(8, budget_bytes // per_row_bytes)

    # Batch split across core chunks (2 -> uses both v7x TensorCores).
    num_chunks = max(1, min(int(num_core_chunks), pl.cdiv(n, 8)))
    per_chunk_rows = _round_up(pl.cdiv(n, num_chunks), 8)
    # Row tiles: multiple of 8 (sublane), never larger than a chunk's rows.
    tile_rows = max(8, (min(tile_rows, per_chunk_rows) // 8) * 8)

    num_row_blocks = pl.cdiv(n, tile_rows)
    tiles_per_chunk = pl.cdiv(num_row_blocks, num_chunks)
    last_block = num_row_blocks - 1

    # Clamp block indices so surplus tiles of the last chunk never index past
    # the array; their contribution is zeroed by the in-kernel row mask.
    def row_block_map(ci, ti):
        return (jnp.minimum(ci * tiles_per_chunk + ti, last_block), 0)

    kernel = functools.partial(
        _focal_loss_kernel,
        alpha=float(alpha),
        gamma=gamma,
        n_rows=n,
        tile_rows=tile_rows,
        tiles_per_chunk=tiles_per_chunk,
    )

    partials = pl.pallas_call(
        kernel,
        # One lane-dense (8,128) partial block per chunk; only [ci*8, 0] is
        # non-zero, so a plain sum in the wrapper recovers the per-chunk totals.
        out_shape=jax.ShapeDtypeStruct((num_chunks * 8, 128), jnp.float32),
        grid_spec=pltpu.PrefetchScalarGridSpec(
            num_scalar_prefetch=0,
            grid=(num_chunks, tiles_per_chunk),
            in_specs=[
                pl.BlockSpec((tile_rows, c), row_block_map),   # logits tile
                pl.BlockSpec((tile_rows, 1), row_block_map),   # targets tile
            ],
            out_specs=pl.BlockSpec((8, 128), lambda ci, ti: (ci, 0)),
            scratch_shapes=[pltpu.VMEM((tile_rows, 1), jnp.float32)],
        ),
        compiler_params=pltpu.CompilerParams(
            # Chunk axis is parallel (megacore shardable); the accumulator runs
            # across the tile axis, which must stay "arbitrary".
            dimension_semantics=("parallel", "arbitrary"),
            vmem_limit_bytes=vmem_limit_bytes,
        ),
    )(logits, targets2d)   # native dtype streamed; cast happens in-kernel

    total = jnp.sum(partials)
    if reduction == "mean":
        total = total / jnp.float32(n)
    return total


def _reference_focal_loss(logits, targets, alpha=0.25, gamma=2):
    # Pure-JAX reference matching torch.nn.functional.cross_entropy semantics.
    logp = jax.nn.log_softmax(logits.astype(jnp.float32), axis=-1)
    ce = -jnp.take_along_axis(logp, targets[:, None], axis=-1)[:, 0]
    pt = jnp.exp(-ce)
    return jnp.mean(alpha * (1.0 - pt) ** gamma * ce)


if __name__ == "__main__":
    key = jax.random.PRNGKey(0)
    k1, k2 = jax.random.split(key)

    # Small shapes: 20 samples x 32 classes. tile_rows=8 forces a ragged
    # multi-tile grid across both chunks (chunk 1 gets a clamped surplus tile)
    # to exercise the pipelined accumulator, masking, and chunk-partial paths.
    N, C = 20, 32
    logits = jax.random.normal(k1, (N, C), dtype=jnp.float32)
    targets = jax.random.randint(k2, (N,), 0, C, dtype=jnp.int32)

    out = focal_loss(logits, targets, alpha=0.25, gamma=2,
                     reduction="mean", tile_rows=8)
    out = jax.block_until_ready(out)

    ref = _reference_focal_loss(logits, targets, alpha=0.25, gamma=2)
    assert jnp.allclose(out, ref, atol=1e-5, rtol=1e-5), (out, ref)

    # Also check 'sum' and the auto tile-size path (single tile per chunk).
    out_sum = jax.block_until_ready(
        focal_loss(logits, targets, alpha=0.25, gamma=2, reduction="sum"))
    ref_sum = ref * N
    assert jnp.allclose(out_sum, ref_sum, atol=1e-4, rtol=1e-5), (out_sum, ref_sum)

    print("KERNEL_OK")
</pallas_src>

<mosaic_0001>
module attributes {stable_mosaic.version = 11 : i64} {
  func.func @_focal_loss_kernel(%arg0: i32, %arg1: i32, %arg2: memref<8x32xf32, #tpu.memory_space<vmem>>, %arg3: memref<8x1xi32, #tpu.memory_space<vmem>>, %arg4: memref<8x128xf32, #tpu.memory_space<vmem>>, %arg5: memref<8x1xf32, #tpu.memory_space<vmem>>) attributes {dimension_semantics = [#tpu.dimension_semantics<parallel>, #tpu.dimension_semantics<arbitrary>], iteration_bounds = array<i64: 2, 2>, scalar_prefetch = 0 : i64, scratch_operands = 1 : i64, tpu.core_type = #tpu.core_type<tc>, window_params = [{transform_indices = @transform_0, window_bounds = array<i64: 8, 32>}, {transform_indices = @transform_1, window_bounds = array<i64: 8, 1>}, {transform_indices = @transform_2, window_bounds = array<i64: 8, 128>}]} {
    %c0_i32 = arith.constant 0 : i32
    %0 = arith.cmpi eq, %arg1, %c0_i32 : i32
    %1 = arith.extui %0 : i1 to i32
    %c0_i32_0 = arith.constant 0 : i32
    %2 = arith.cmpi ne, %1, %c0_i32_0 : i32
    scf.if %2 {
      %cst_19 = arith.constant 0.000000e+00 : f32
      %54 = vector.broadcast %cst_19 : f32 to vector<8x1xf32>
      %c0_20 = arith.constant 0 : index
      %c0_21 = arith.constant 0 : index
      %55 = vector.load %arg5[%c0_20, %c0_21] : memref<8x1xf32, #tpu.memory_space<vmem>>, vector<8x1xf32>
      tpu.vector_store %arg5[%c0_20, %c0_21], %54 {strides = array<i32>} : memref<8x1xf32, #tpu.memory_space<vmem>>, vector<8x1xf32>,
    } else {
    }
    %c0 = arith.constant 0 : index
    %c0_1 = arith.constant 0 : index
    %3 = vector.load %arg2[%c0, %c0_1] : memref<8x32xf32, #tpu.memory_space<vmem>>, vector<8x32xf32>
    %c0_2 = arith.constant 0 : index
    %c0_3 = arith.constant 0 : index
    %4 = vector.load %arg3[%c0_2, %c0_3] : memref<8x1xi32, #tpu.memory_space<vmem>>, vector<8x1xi32>
    %cst = arith.constant dense<0xFF800000> : vector<8xf32>
    %5 = vector.multi_reduction <maximumf>, %3, %cst [1] : vector<8x32xf32> to vector<8xf32>
    %6 = vector.shape_cast %5 : vector<8xf32> to vector<8x1xf32>
    %7 = vector.broadcast %6 : vector<8x1xf32> to vector<8x32xf32>
    %8 = arith.subf %3, %7 : vector<8x32xf32>
    %9 = math.exp %8 : vector<8x32xf32>
    %cst_4 = arith.constant dense<0.000000e+00> : vector<8xf32>
    %10 = vector.multi_reduction <add>, %9, %cst_4 [1] : vector<8x32xf32> to vector<8xf32>
    %11 = vector.shape_cast %10 : vector<8xf32> to vector<8x1xf32>
    %12 = math.log %11 : vector<8x1xf32>
    %13 = arith.addf %6, %12 : vector<8x1xf32>
    %14 = tpu.iota {dimensions = array<i32: 1>} : vector<1x32xi32>
    %15 = vector.broadcast %14 : vector<1x32xi32> to vector<8x32xi32>
    %16 = vector.broadcast %4 : vector<8x1xi32> to vector<8x32xi32>
    %17 = arith.cmpi eq, %15, %16 : vector<8x32xi32>
    %cst_5 = arith.constant 0.000000e+00 : f32
    %18 = vector.broadcast %cst_5 : f32 to vector<8x32xf32>
    %19 = arith.select %17, %3, %18 : vector<8x32xi1>, vector<8x32xf32>
    %cst_6 = arith.constant dense<0.000000e+00> : vector<8xf32>
    %20 = vector.multi_reduction <add>, %19, %cst_6 [1] : vector<8x32xf32> to vector<8xf32>
    %21 = vector.shape_cast %20 : vector<8xf32> to vector<8x1xf32>
    %22 = arith.subf %13, %21 : vector<8x1xf32>
    %cst_7 = arith.constant 0.000000e+00 : f32
    %23 = vector.broadcast %cst_7 : f32 to vector<8x1xf32>
    %24 = arith.maximumf %22, %23 : vector<8x1xf32>
    %cst_8 = arith.constant 0.000000e+00 : f32
    %25 = vector.broadcast %cst_8 : f32 to vector<8x1xf32>
    %26 = arith.subf %25, %24 : vector<8x1xf32>
    %27 = math.exp %26 : vector<8x1xf32>
    %cst_9 = arith.constant 1.000000e+00 : f32
    %28 = vector.broadcast %cst_9 : f32 to vector<8x1xf32>
    %29 = arith.subf %28, %27 : vector<8x1xf32>
    %cst_10 = arith.constant 0.000000e+00 : f32
    %30 = vector.broadcast %cst_10 : f32 to vector<8x1xf32>
    %31 = arith.maximumf %29, %30 : vector<8x1xf32>
    %cst_11 = arith.constant 1.000000e+00 : f32
    %32 = vector.broadcast %cst_11 : f32 to vector<8x1xf32>
    %33 = arith.mulf %32, %31 : vector<8x1xf32>
    %34 = arith.mulf %33, %31 : vector<8x1xf32>
    %cst_12 = arith.constant 2.500000e-01 : f32
    %35 = vector.broadcast %cst_12 : f32 to vector<8x1xf32>
    %36 = arith.mulf %35, %34 : vector<8x1xf32>
    %37 = arith.mulf %36, %24 : vector<8x1xf32>
    %c2_i32 = arith.constant 2 : i32
    %38 = arith.muli %arg0, %c2_i32 : i32
    %39 = arith.addi %38, %arg1 : i32
    %40 = tpu.iota {dimensions = array<i32: 0>} : vector<8x1xi32>
    %c8_i32 = arith.constant 8 : i32
    %41 = arith.muli %39, %c8_i32 : i32
    %42 = vector.broadcast %41 : i32 to vector<8x1xi32>
    %43 = arith.addi %40, %42 : vector<8x1xi32>
    %c20_i32 = arith.constant 20 : i32
    %44 = vector.broadcast %c20_i32 : i32 to vector<8x1xi32>
    %45 = arith.cmpi slt, %43, %44 : vector<8x1xi32>
    %cst_13 = arith.constant 0.000000e+00 : f32
    %46 = vector.broadcast %cst_13 : f32 to vector<8x1xf32>
    %47 = arith.select %45, %37, %46 : vector<8x1xi1>, vector<8x1xf32>
    %c0_14 = arith.constant 0 : index
    %c0_15 = arith.constant 0 : index
    %48 = vector.load %arg5[%c0_14, %c0_15] : memref<8x1xf32, #tpu.memory_space<vmem>>, vector<8x1xf32>
    %49 = arith.addf %48, %47 : vector<8x1xf32>
    %c0_16 = arith.constant 0 : index
    %c0_17 = arith.constant 0 : index
    %50 = vector.load %arg5[%c0_16, %c0_17] : memref<8x1xf32, #tpu.memory_space<vmem>>, vector<8x1xf32>
    tpu.vector_store %arg5[%c0_16, %c0_17], %49 {strides = array<i32>} : memref<8x1xf32, #tpu.memory_space<vmem>>, vector<8x1xf32>,
    %c1_i32 = arith.constant 1 : i32
    %51 = arith.cmpi eq, %arg1, %c1_i32 : i32
    %52 = arith.extui %51 : i1 to i32
    %c0_i32_18 = arith.constant 0 : i32
    %53 = arith.cmpi ne, %52, %c0_i32_18 : i32
    scf.if %53 {
      %c0_19 = arith.constant 0 : index
      %c0_20 = arith.constant 0 : index
      %54 = vector.load %arg5[%c0_19, %c0_20] : memref<8x1xf32, #tpu.memory_space<vmem>>, vector<8x1xf32>
      %55 = vector.shape_cast %54 : vector<8x1xf32> to vector<1x8x1xf32>
      %cst_21 = arith.constant dense<0.000000e+00> : vector<1xf32>
      %56 = vector.multi_reduction <add>, %55, %cst_21 [1, 2] : vector<1x8x1xf32> to vector<1xf32>
      %57 = vector.shape_cast %56 : vector<1xf32> to vector<1x1x1xf32>
      %58 = vector.extract %57[0, 0, 0] : f32 from vector<1x1x1xf32>
      %59 = vector.broadcast %58 : f32 to vector<1x1xf32>
      %60 = tpu.iota {dimensions = array<i32: 0>} : vector<8x128xi32>
      %c0_i32_22 = arith.constant 0 : i32
      %61 = vector.broadcast %c0_i32_22 : i32 to vector<8x128xi32>
      %62 = arith.cmpi eq, %60, %61 : vector<8x128xi32>
      %63 = tpu.iota {dimensions = array<i32: 1>} : vector<8x128xi32>
      %c0_i32_23 = arith.constant 0 : i32
      %64 = vector.broadcast %c0_i32_23 : i32 to vector<8x128xi32>
      %65 = arith.cmpi eq, %63, %64 : vector<8x128xi32>
      %66 = arith.andi %62, %65 : vector<8x128xi1>
      %cst_24 = arith.constant 0.000000e+00 : f32
      %67 = vector.shape_cast %59 : vector<1x1xf32> to vector<1x1xf32>
      %68 = vector.broadcast %67 : vector<1x1xf32> to vector<8x128xf32>
      %69 = vector.broadcast %cst_24 : f32 to vector<8x128xf32>
      %70 = arith.select %66, %68, %69 : vector<8x128xi1>, vector<8x128xf32>
      %c0_25 = arith.constant 0 : index
      %c0_26 = arith.constant 0 : index
      %71 = vector.load %arg4[%c0_25, %c0_26] : memref<8x128xf32, #tpu.memory_space<vmem>>, vector<8x128xf32>
      tpu.vector_store %arg4[%c0_25, %c0_26], %70 {strides = array<i32>} : memref<8x128xf32, #tpu.memory_space<vmem>>, vector<8x128xf32>,
    } else {
    }
    return
  }
  func.func @transform_0(%arg0: i32, %arg1: i32) -> (i32, i32) {
    %c2_i32 = arith.constant 2 : i32
    %0 = arith.muli %arg0, %c2_i32 : i32
    %1 = arith.addi %0, %arg1 : i32
    %c2_i32_0 = arith.constant 2 : i32
    %2 = arith.minsi %1, %c2_i32_0 : i32
    %c0_i32 = arith.constant 0 : i32
    %c0_i32_1 = arith.constant 0 : i32
    return %2, %c0_i32 : i32, i32
  }
  func.func @transform_1(%arg0: i32, %arg1: i32) -> (i32, i32) {
    %c2_i32 = arith.constant 2 : i32
    %0 = arith.muli %arg0, %c2_i32 : i32
    %1 = arith.addi %0, %arg1 : i32
    %c2_i32_0 = arith.constant 2 : i32
    %2 = arith.minsi %1, %c2_i32_0 : i32
    %c0_i32 = arith.constant 0 : i32
    %c0_i32_1 = arith.constant 0 : i32
    return %2, %c0_i32 : i32, i32
  }
  func.func @transform_2(%arg0: i32, %arg1: i32) -> (i32, i32) {
    %c0_i32 = arith.constant 0 : i32
    %c0_i32_0 = arith.constant 0 : i32
    return %arg0, %c0_i32 : i32, i32
  }
}

</mosaic_0001>

<bundles_post_ra>
// kernel: tpu_custom_call.1
= control target key start
LH: loop header
LB: loop body
LE: loop exit
PB: predicated region body
PF: predicated region fallthrough
CT: control target
= control target key end

     0   :  { %7 = vsyncpa [#allocation4], 0  ;;  %s769_s0 = inlined_call_operand.vmem [shape: f32[20,32], index: 0, kind: input, shape index: {}]   ;;  %s770_s1 = inlined_call_operand.vmem [shape: s32[20,1], index: 1, kind: input, shape index: {}]   ;;  %s771_s2 = inlined_call_operand.hbm [shape: f32[16,128], index: 2, kind: output, shape index: {}]  }
   0x1   :  { %9 = vsyncpa [#allocation4 + $0x1], 0  ;;  %s619_s9 = smov 0   ;;  %s621_s10 = smov 0  }
   0x2   :  { %s623_s11 = smov 0   ;;  %s625_s12 = smov 0  }
   0x3   :  { %s627_s13 = smov 0   ;;  %s629_s14 = smov 0  }
   0x4   :  { %s631_s15 = smov 0   ;;  %s633_s16 = smov 0  }
   0x5 LB: > { %s395_s17 = sadd.s32 4294967295, %s599_s16   ;;  %s396_s18 = sadd.s32 4294967294, %s599_s16   ;;  %s599_s16 = sphi %s633_s16, %s15_s16   ;;  %s595_s15 = sphi %s631_s15, %s780_s15   ;;  %s591_s14 = sphi %s629_s14, %s779_s14   ;;  %s587_s13 = sphi %s627_s13, %s778_s13   ;;  %s583_s12 = sphi %s625_s12, %s777_s12   ;;  %s579_s11 = sphi %s623_s11, %s776_s11   ;;  %s575_s10 = sphi %s621_s10, %s775_s10   ;;  %s571_s9 = sphi %s619_s9, %s774_s9  }
   0x6   : > { %s24_s19 = sadd.s32 1, %s591_s14  ;;  %s27_s20 = sadd.s32 1, %s595_s15 }
   0x7   : > { %p25_p0 = scmp.ge.s32.totalorder %s24_s19, 2  ;;  %p112_p1 = scmp.ne.s32.totalorder %s579_s11, %s575_s10 }
   0x8   : > { %p113_p2 = scmp.eq.s32.totalorder %s395_s17, 3  ;;  %p118_p4 = scmp.ne.s32.totalorder %s575_s10, %s571_s9 }
   0x9   : > { %s782_s19 = smov (%p25_p0, %s24_s19), 0  ;;  %s784_s20 = smov (!%p25_p0, %s27_s20), %s595_s15 }
   0xa   : > { %p668_p3 = por %p113_p2, %p112_p1  ;;  %p29_p5 = scmp.ge.s32.totalorder %s784_s20, 2 }
   0xb   : > { %p119_p6 = scmp.eq.s32.totalorder %s396_s18, 3  ;;  %p403_p7 = scmp.ge.s32.totalorder %s599_s16, 1 }
   0xc   : > { %p167_p8 = scmp.lt.s32.totalorder %s599_s16, 5  ;;  %s786_s20 = smov (%p29_p5, %s784_s20), 0 }
   0xd   : > { %p678_p9 = por %p119_p6, %p118_p4  ;;  %s99_s23 = ssub.s32 %s595_s15, %s786_s20 }
   0xe   : > { %p168_p10 = pnand %p403_p7, %p167_p8  ;;  %s102_s24 = sadd.s32 1, %s579_s11 }
   0xf   : > { %p100_p11 = scmp.eq.s32.totalorder %s99_s23, 0  ;;  %s197_s26 = sand.u32 (!%p168_p10), 1, %s575_s10  }
  0x10   : > { %171 = sbr.rel (%p168_p10) target bundleno = 620 (0x26c), region = 28  ;;  %s405_s27 = sshll.u32 (!%p168_p10), %s587_s13, 1 }
  0x11   : > { %s686_s25 = scalar_select %p100_p11, %s579_s11, %s102_s24  }
  0x12   : > { %s692_s28 = sshll.u32 (!%p168_p10), %s197_s26, 3  ;;  %s695_s29 = sadd.s32 (!%p168_p10), %s583_s12, %s405_s27 }
  0x13   : > { %p202_p12 = scmp.lt.s32.totalorder (!%p168_p10), %s695_s29, 2  ;;  %s199_s18 = scalar_lea.vmem (!%p168_p10), [#allocation3], %s692_s28 }
  0x14   : > { %p415_p13 = scmp.ne.s32.totalorder (!%p168_p10), %s583_s12, 0 }
  0x17   : > { %s203_s30 = scalar_select %p202_p12, %s695_s29, 2 }
  0x18   : > { %227 = sbr.rel (%p415_p13) target bundleno = 31 (0x1f), region = 32  ;;  %vm228_vm0 = vcmask (!%p415_p13), 7168   ;;  %v601_v0 = vmov (!%p415_p13), 0.0  }
  0x19   : > { %s788_s30 = smov (!%p202_p12, %s203_s30), 2  ;;  %229 = vst.msk [vmem:[#allocation2] sm:$0xff] (!%p415_p13), %vm228_vm0, %v601_v0 }
  0x1a   : > { %s409_s3 = sshll.u32 %s788_s30, 3 }
  0x1b   : > { %s207_s6 = scalar_lea.vmem %s769_s0, %s409_s3  ;;  %s219_s17 = scalar_lea.vmem %s770_s1, %s409_s3 }
  0x1f PF: > { %v230_v1 = vld [vmem:[%s207_s6] sm:$0xff]  ;;  %vm232_vm1 = vcmask 261120   ;;  %v602_v3 = vmov 0   ;;  %v245_v8 = vlaneseq  ;;  %s417_s23 = sshll.u32 %s695_s29, 3  ;;  %vm276_vm4 = vcmask 7168   ;;  %p418_p0 = scmp.ne.s32.totalorder %s583_s12, 1 }
  0x20   : > { %v233_v2 = vsel %vm232_vm1, %v230_v1, -inf  ;;  %498 = vset.pattern.permute.xlu0 %v602_v3  ;;  %v231_v4 = vld [vmem:[%s219_s17] sm:$0xff]  ;;  %v270_v26 = vstv %s417_s23 }
  0x21   : > { %234 = vmax.xlane.f32.xlu0 %v233_v2  ;;  %v246_v9 = vand.u32 127, %v245_v8  ;;  %v268_v25 = vshrl.u32 %v245_v8, 7  ;;  %v274_v32 = vld [vmem:[#allocation2] sm:$0xff] }
  0x23   : > { %v271_v29 = vadd.s32 %v270_v26, %v268_v25  ;;  %vm293_vm5 = vcmp.eq.s32.totalorder (!%p418_p0), %v268_v25, 0  ;;  %vm294_vm6 = vcmp.eq.s32.totalorder (!%p418_p0), %v246_v9, 0 }
  0x24   : > { %vm295_vm7 = vmand (!%p418_p0), %vm293_vm5, %vm294_vm6 }
  0x25   : > { %vm272_vm3 = vcmp.lt.s32.totalorder %v271_v29, 20 }
  0x37   : > { %248 = vperm.xlu0 %498, %v231_v4  }
  0xae   : > { %v235_v5 = vpop.xlane.xlu0 %234 }
  0xaf   : > { %v236_v6 = vsub.f32 %v230_v1, %v235_v5 }
  0xb1   : > { %v237_v7 = vmul.f32 1.442695, %v236_v6 }
  0xb3   : > { %499 = vpow2.f32 %v237_v7 }
  0xb6   : > { %v249_v10 = vpop.permute.xlu0 %248 }
  0xb7   : > { %vm250_vm2 = vcmp.eq.s32.totalorder %v246_v9, %v249_v10 }
  0xb8   : > { %v251_v12 = vsel %vm250_vm2, %v230_v1, 0.0 }
  0xb9   : > { %v252_v14 = vsel %vm232_vm1, %v251_v12, 0.0 }
  0xbd   : > { %v500_v11 = vpop.eup %499 }
  0xbe   : > { %v239_v13 = vsel %vm232_vm1, %v500_v11, 0.0 }
  0xbf   : > { %240 = vadd.xlane.f32.xlu1 %v239_v13 }
  0xc3   : > { %253 = vadd.xlane.f32.xlu1 %v252_v14 }
 0x14c   : > { %v241_v15 = vpop.xlane.xlu1 %240 }
 0x14d   : > { %501 = vlog2.f32 %v241_v15 }
 0x150   : > { %v254_v18 = vpop.xlane.xlu1 %253 }
 0x157   : > { %v502_v16 = vpop.eup %501 }
 0x158   : > { %v243_v17 = vmul.f32 0.6931472, %v502_v16 }
 0x15a   : > { %v244_v19 = vadd.f32 %v243_v17, %v235_v5 }
 0x15c   : > { %v255_v20 = vsub.f32 %v244_v19, %v254_v18 }
 0x15e   : > { %v256_v21 = vmax.f32 %v255_v20, 0.0 }
 0x160   : > { %v257_v22 = vsub.f32 0.0, %v256_v21 }
 0x162   : > { %v258_v23 = vmul.f32 1.442695, %v257_v22 }
 0x164   : > { %503 = vpow2.f32 %v258_v23 }
 0x16e   : > { %v504_v24 = vpop.eup %503 }
 0x16f   : > { %v260_v27 = vsub.f32 1.0, %v504_v24 }
 0x171   : > { %v261_v28 = vmax.f32 %v260_v27, 0.0 }
 0x173   : > { %v262_v30 = vmul.f32 %v261_v28, %v261_v28 }
 0x175   : > { %v263_v31 = vmul.f32 0.25, %v262_v30 }
 0x176   : > { %281 = sbr.rel (%p418_p0) target bundleno = 596 (0x254), region = 36 }
 0x177   : > { %v264_v33 = vmul.f32 %v263_v31, %v256_v21 }
 0x179   : > { %v273_v34 = vsel %vm272_vm3, %v264_v33, 0.0 }
 0x17a   : > { %v275_v35 = vadd.f32 %v274_v32, %v273_v34 }
 0x17c   : > { %277 = vst.msk [vmem:[#allocation2] sm:$0xff] %vm276_vm4, %v275_v35 }
 0x183   : > { %v282_v36 = vld [vmem:[#allocation2] sm:$0xff] }
 0x184   : > { %v283_v37 = vsel %vm276_vm4, %v282_v36, 0.0 }
 0x185   : > { %284 = vadd.xlane.f32.xlu0 %v283_v37 }
 0x212   : > { %v285_v38 = vpop.xlane.xlu0 %284 }
 0x213   : > { %v286_v39 = vrot.slane %v285_v38, 4 }
 0x215   : > { %v287_v40 = vadd.f32 %v286_v39, %v285_v38 }
 0x217   : > { %v288_v41 = vrot.slane %v287_v40, 2 }
 0x219   : > { %v289_v42 = vadd.f32 %v288_v41, %v287_v40 }
 0x21b   : > { %v290_v43 = vrot.slane %v289_v42, 1 }
 0x21d   : > { %v291_v44 = vadd.f32 %v290_v43, %v289_v42 }
 0x21f   : > { %423 = vpush %v291_v44 }
 0x250   : > { %s424_s24 = spop %423 }
 0x251   : > { %v296_v45 = vstv %s424_s24 }
 0x252   : > { %v297_v46 = vsel %vm295_vm7, %v296_v45, 0.0 }
 0x253   : > { %298 = vst [vmem:[%s199_s18] sm:$0xff] %v297_v46 }
 0x254 PF: > { %s420_s12 = sshll.u32 %s587_s13, 7  ;;  %s313_s3 = sshll.u32 %s199_s18, 4  ;;  %s314_s3 = int_to_ptr.vmem [resolvable:$true] %s313_s3 }
 0x255   : > { %s718_s30 = scalar_lea.hbm %s771_s2, %s420_s12  ;;  %s300_s4 = scalar_lea.sflag [#allocation4], %s197_s26 }
 0x256   : > { %s505_s5 = scalar_lea.vmem %s314_s3, 128  ;;  %s603_s6 = smov [#allocation3]  }
 0x257   : > { %p506_p1 = scmp.ne.s32.totalorder %s314_s3, %s505_s5  ;;  %s509_s7 = sshll.u32 %s603_s6, 4  ;;  %s510_s7 = int_to_ptr.vmem [resolvable:$false] %s509_s7 }
 0x258   : > { %s511_s8 = scalar_lea.vmem %s510_s7, 256  ;;  %p512_p5 = scmp.lt.s32.totalorder %s314_s3, %s510_s7 }
 0x259   : > { %p507_p2 = pnand %p506_p1, %p668_p3  ;;  %p513_p6 = scmp.lt.s32.totalorder %s511_s8, %s505_s5 }
 0x25b   : > { %p508_p4 = pneg %p507_p2  ;;  %p514_p7 = por %p513_p6, %p512_p5 }
 0x25d   : > { %p515_p8 = pnand %p514_p7, %p508_p4 }
 0x25f   : > { %518 = shalt.err (!%p515_p8)
}
 0x260   : > { %s519_s13 = scalar_lea.hbm %s718_s30, 128  ;;  %s523_s17 = scalar_lea.hbm %s771_s2, 256 }
 0x261   : > { %p520_p10 = scmp.ne.s32.totalorder %s718_s30, %s519_s13  ;;  %p524_p13 = scmp.lt.u32.totalorder %s718_s30, %s771_s2 }
 0x262   : > { %p525_p0 = scmp.lt.u32.totalorder %s523_s17, %s519_s13  ;;  %p527_p2 = scmp.lt.u32.totalorder %s519_s13, %s718_s30 }
 0x263   : > { %p521_p11 = pnand %p520_p10, %p668_p3 }
 0x264   : > { %p526_p1 = por %p525_p0, %p524_p13 }
 0x265   : > { %p522_p12 = pneg %p521_p11 }
 0x266   : > { %p528_p4 = por %p527_p2, %p526_p1 }
 0x268   : > { %p529_p5 = pnand %p528_p4, %p522_p12 }
 0x26a   : > { %532 = shalt.err (!%p529_p5)
}
 0x26b   : > { %425 = dma.vmem_to_hbm [thread:$0]  (%p668_p3), %s314_s3, 128, %s718_s30, %s300_s4  }
 0x26c PF: > { %p431_p6 = scmp.ge.s32.totalorder %s599_s16, 2  ;;  %s325_s24 = sand.u32 1, %s571_s9  }
 0x26d   : > { %s326_s12 = scalar_lea.sflag [#allocation4], %s325_s24 }
 0x26e   : > { %p428_p7 = pnand %p431_p6, %p678_p9 }
 0x270   : > { %566 = dma.done.wait (!%p428_p7), %s326_s12, 128  }
 0x271   : > { %568 = vsyncadd (!%p428_p7), %s326_s12, 4294967168  ;;  %s15_s16 = sadd.s32 1, %s599_s16   ;;  %s774_s9 = smov %s575_s10 }
 0x272   : > { %p12_p8 = scmp.ge.s32.totalorder %s15_s16, 6   ;;  %s775_s10 = smov %s579_s11 }
 0x273   : > { %s776_s11 = smov %s686_s25  ;;  %s777_s12 = smov %s591_s14 }
 0x274   : > { %s778_s13 = smov %s595_s15  ;;  %s779_s14 = smov %s782_s19 }
 0x275   : > { %s780_s15 = smov %s786_s20  ;;  %14 = sbr.rel (!%p12_p8) target bundleno = 5 (0x5), region = 74 }
 0x27c   :  { %331 = vsyncpa [#allocation4], 1 }
 0x27d   :  { %333 = vsyncpa [#allocation4 + $0x1], 1 }

</bundles_post_ra>
